<compile_context>
chip_gen: v6e
topology: v6e:2x2x1
jax: 0.10.0
libtpu: 0.0.40
codegen_flags: <defaults>
</compile_context>

<pallas_src>
import math
import functools

import jax
import jax.numpy as jnp
from jax.experimental import pallas as pl
from jax.experimental.pallas import tpu as pltpu


# ------------------------------------------------------------------ kernel ---
def attention_kernel(tok_ref, base_ref, d01_ref, w_ref, mask_ref, bo_ref,
                     out_ref, *, emb_dim):
    D = emb_dim
    M = tok_ref.shape[0]                    # M = Bt * L (batch folded into MXU rows)

    # --- embedding (2-row table -> linear blend) + positional encoding (VPU) --
    t = tok_ref[...]                        # (M, 1) f32, values in {0., 1.}
    x = base_ref[...] + t * d01_ref[...]    # emb[token] + PE, (M, D) f32
    x_b = x.astype(jnp.bfloat16)

    # --- fused projection: [Wq/sqrt(D) | Wk | Wv@Wo] in ONE MXU pass ----------
    qkv = jnp.dot(x_b, w_ref[...], preferred_element_type=jnp.float32)  # (M, 2D+1)
    q = qkv[:, :D].astype(jnp.bfloat16)
    k = qkv[:, D:2 * D].astype(jnp.bfloat16)
    vh = qkv[:, 2 * D:]                     # (M, 1) f32 == x @ (Wv @ Wo)

    # --- dense scores + block-diagonal mask (one well-shaped MXU pass) --------
    s = jnp.einsum("md,nd->mn", q, k,
                   preferred_element_type=jnp.float32)                  # (M, M)
    s = s + mask_ref[...]                   # 0 inside own example, -1e30 elsewhere

    # --- numerically-stable softmax in f32; denominator via EUP reciprocal ----
    s = s - jnp.max(s, axis=-1, keepdims=True)
    e = jnp.exp(s)                          # masked entries underflow to 0
    denom = jnp.sum(e, axis=-1, keepdims=True)                          # (M, 1)

    # --- attention-weighted, head-projected values: (M,M) @ (M,1) -------------
    num = jnp.dot(e, vh, preferred_element_type=jnp.float32)            # (M, 1)
    out = num * pl.reciprocal(denom, approx=True) + bo_ref[0, 0]        # + bias (SMEM)

    # lane-dense store: one (1, 1, M) slab per grid step (M % 128 == 0)
    out_ref[...] = out.reshape(1, 1, M)


# ----------------------------------------------------------------- wrapper ---
def _batch_tile(batch, seq_len, *, rows_target=2048, max_batch_tile=64,
                max_rows=1024):
    """Batch elements per grid step.
      * Bt*L is kept a multiple of 128  -> unmasked lane-dense output stores.
      * Bt <= max_batch_tile and Bt*L <= max_rows bound the Bt^2 redundant work
        of the dense block-masked score matmul and its VMEM footprint.
      * ~rows_target MXU rows per step amortize the ~0.35us/step overhead.
      * >= 2 grid steps are kept when the batch allows it (v7x: 2 TensorCores
        share the "parallel" grid axis).  v5e/v6e simply get the largest tile."""
    lane_align = 128 // math.gcd(seq_len, 128)
    if lane_align * seq_len <= max_rows:
        align = lane_align                              # full 128-lane alignment
    else:
        align = max(1, 8 // math.gcd(seq_len, 8))       # fall back to sublane align
    bt_cap = min(max_batch_tile,
                 max(1, max_rows // seq_len),
                 max(1, rows_target // seq_len))
    bt = max(align, (bt_cap // align) * align)
    if batch > align:
        half = -(-batch // 2)
        bt = min(bt, max(align, -(-half // align) * align))   # keep >= 2 tiles
    else:
        bt = align                                            # smallest aligned tile
    return bt


def _positional_encoding(seq_len, emb_dim):
    pos = jnp.arange(seq_len, dtype=jnp.float32)[:, None]                 # (L, 1)
    div = jnp.exp(jnp.arange(0, emb_dim, 2, dtype=jnp.float32)
                  * (-math.log(10000.0) / emb_dim))                       # (D/2,)
    pe = jnp.zeros((seq_len, emb_dim), jnp.float32)
    pe = pe.at[:, 0::2].set(jnp.sin(pos * div))
    pe = pe.at[:, 1::2].set(jnp.cos(pos * div))
    return pe


@functools.partial(jax.jit, static_argnames=("positional_encoding",))
def attention_forward(tokens, params, *, positional_encoding=True):
    """tokens: (B, L) integer in {0, 1}.  Returns (B, L) float32."""
    emb = params["embedding"]                               # (2, D)
    wq, wk, wv = params["wq"], params["wk"], params["wv"]   # (D, D) each, (in, out)
    wo, bo = params["wo"], params["bo"]                     # (D, 1), (1, 1)

    B, L = tokens.shape
    D = emb.shape[1]

    Bt = _batch_tile(B, L)
    num_tiles = -(-B // Bt)
    B_pad = num_tiles * Bt
    M = Bt * L

    # --- constants (index_map == (0,0) every step -> DMA'd once) --------------
    # TODO(synk): reference PE module applies dropout(p=0.1) in train mode; we
    # implement eval-mode semantics (no dropout).
    pe = (_positional_encoding(L, D) if positional_encoding
          else jnp.zeros((L, D), jnp.float32))
    base = jnp.tile(pe, (Bt, 1)) + emb[0][None, :]          # PE + emb row 0, (M, D)
    d01 = (emb[1] - emb[0]).reshape(1, D).astype(jnp.float32)

    scale = 1.0 / math.sqrt(D)
    wvo = jnp.dot(wv, wo)                                   # Linear(D,1) folded into V
    w_all = jnp.concatenate([wq * scale, wk, wvo],
                            axis=1).astype(jnp.bfloat16)    # (D, 2D+1)

    ids = jnp.arange(M, dtype=jnp.int32) // L               # block-diag additive mask
    mask = jnp.where(ids[:, None] == ids[None, :], 0.0, -1e30).astype(jnp.float32)

    bo_s = bo.reshape(1, 1).astype(jnp.float32)

    # --- per-step streamed input: 4 B/token (f32 token id column) -------------
    tok = tokens.astype(jnp.float32)
    if B_pad != B:
        tok = jnp.pad(tok, ((0, B_pad - B), (0, 0)))        # padded rows self-contained
    tok_col = tok.reshape(B_pad * L, 1)

    kernel = functools.partial(attention_kernel, emb_dim=D)

    out = pl.pallas_call(
        kernel,
        out_shape=jax.ShapeDtypeStruct((num_tiles, 1, M), jnp.float32),
        grid_spec=pltpu.PrefetchScalarGridSpec(
            num_scalar_prefetch=0,
            grid=(num_tiles,),
            in_specs=[
                pl.BlockSpec((M, 1), lambda t: (t, 0)),             # token ids (streamed)
                pl.BlockSpec((M, D), lambda t: (0, 0)),             # PE + emb0 (constant)
                pl.BlockSpec((1, D), lambda t: (0, 0)),             # emb1 - emb0 (constant)
                pl.BlockSpec((D, 2 * D + 1), lambda t: (0, 0)),     # packed weights
                pl.BlockSpec((M, M), lambda t: (0, 0)),             # block-diagonal mask
                pl.BlockSpec(memory_space=pltpu.MemorySpace.SMEM),  # output bias
            ],
            out_specs=pl.BlockSpec((1, 1, M), lambda t: (t, 0, 0)),
        ),
        compiler_params=pltpu.CompilerParams(
            dimension_semantics=("parallel",),   # lets v7x shard tiles over 2 TCs
        ),
    )(tok_col, base, d01, w_all, mask, bo_s)

    # (num_tiles, 1, M) -> (B_pad, L) -> drop padded rows
    return out.reshape(B_pad, L)[:B]


# ----------------------------------------------------- pure-JAX reference ----
def attention_reference(tokens, params, *, positional_encoding=True):
    emb = params["embedding"]
    wq, wk, wv = params["wq"], params["wk"], params["wv"]
    wo, bo = params["wo"], params["bo"]
    B, L = tokens.shape
    D = emb.shape[1]
    x = emb[tokens]
    if positional_encoding:
        x = x + _positional_encoding(L, D)[None, :, :]
    q, k, v = x @ wq, x @ wk, x @ wv
    s = jnp.einsum("bld,bmd->blm", q, k) / math.sqrt(D)
    p = jax.nn.softmax(s, axis=-1)
    nv = jnp.einsum("blm,bmd->bld", p, v)
    return (nv @ wo + bo[0, 0])[..., 0]


# ------------------------------------------------------------------- setup ---
def init_params(key, embedding_dim=16):
    D = embedding_dim
    k_emb, k_q, k_k, k_v, k_o, k_b = jax.random.split(key, 6)
    bound = 1.0 / math.sqrt(D)
    return {
        # nn.Embedding(2, D): N(0, 1)
        "embedding": jax.random.normal(k_emb, (2, D), jnp.float32),
        # nn.Linear(D, D, bias=False): U(-1/sqrt(D), 1/sqrt(D)); stored (in, out)
        "wq": jax.random.uniform(k_q, (D, D), jnp.float32, -bound, bound),
        "wk": jax.random.uniform(k_k, (D, D), jnp.float32, -bound, bound),
        "wv": jax.random.uniform(k_v, (D, D), jnp.float32, -bound, bound),
        # nn.Linear(D, 1): weight (D, 1) (in, out) and bias (1, 1)
        "wo": jax.random.uniform(k_o, (D, 1), jnp.float32, -bound, bound),
        "bo": jax.random.uniform(k_b, (1, 1), jnp.float32, -bound, bound),
    }


if __name__ == "__main__":
    key = jax.random.PRNGKey(0)
    k_params, k_tok = jax.random.split(key)

    B, L, D = 2, 8, 16
    params = init_params(k_params, embedding_dim=D)
    tokens = jax.random.randint(k_tok, (B, L), 0, 2, dtype=jnp.int32)

    out = attention_forward(tokens, params, positional_encoding=True)
    jax.block_until_ready(out)
    assert out.shape == (B, L) and out.dtype == jnp.float32

    ref = attention_reference(tokens, params, positional_encoding=True)
    err = float(jnp.max(jnp.abs(out - ref)))
    assert err < 5e-2, f"max abs err {err}"

    print("KERNEL_OK")
</pallas_src>

<mosaic_0001>
module attributes {stable_mosaic.version = 11 : i64} {
  func.func @attention_kernel(%arg0: i32, %arg1: memref<128x1xf32, #tpu.memory_space<vmem>>, %arg2: memref<128x16xf32, #tpu.memory_space<vmem>>, %arg3: memref<1x16xf32, #tpu.memory_space<vmem>>, %arg4: memref<16x33xbf16, #tpu.memory_space<vmem>>, %arg5: memref<128x128xf32, #tpu.memory_space<vmem>>, %arg6: memref<1x1xf32, #tpu.memory_space<smem>>, %arg7: memref<1x1x128xf32, #tpu.memory_space<vmem>>) attributes {dimension_semantics = [#tpu.dimension_semantics<parallel>], iteration_bounds = array<i64: 1>, scalar_prefetch = 0 : i64, scratch_operands = 0 : i64, tpu.core_type = #tpu.core_type<tc>, window_params = [{transform_indices = @transform_0, window_bounds = array<i64: 128, 1>}, {pipeline_mode = #tpu.pipeline_mode<synchronous>, transform_indices = @transform_1, window_bounds = array<i64: 128, 16>}, {pipeline_mode = #tpu.pipeline_mode<synchronous>, transform_indices = @transform_2, window_bounds = array<i64: 1, 16>}, {pipeline_mode = #tpu.pipeline_mode<synchronous>, transform_indices = @transform_3, window_bounds = array<i64: 16, 33>}, {pipeline_mode = #tpu.pipeline_mode<synchronous>, transform_indices = @transform_4, window_bounds = array<i64: 128, 128>}, {transform_indices = @transform_5, window_bounds = array<i64: 1, 1>}, {transform_indices = @transform_6, window_bounds = array<i64: 1, 1, 128>}]} {
    %c0 = arith.constant 0 : index
    %c0_0 = arith.constant 0 : index
    %0 = vector.load %arg1[%c0, %c0_0] : memref<128x1xf32, #tpu.memory_space<vmem>>, vector<128x1xf32>
    %c0_1 = arith.constant 0 : index
    %c0_2 = arith.constant 0 : index
    %1 = vector.load %arg2[%c0_1, %c0_2] : memref<128x16xf32, #tpu.memory_space<vmem>>, vector<128x16xf32>
    %c0_3 = arith.constant 0 : index
    %c0_4 = arith.constant 0 : index
    %2 = vector.load %arg3[%c0_3, %c0_4] : memref<1x16xf32, #tpu.memory_space<vmem>>, vector<1x16xf32>
    %3 = vector.broadcast %0 : vector<128x1xf32> to vector<128x16xf32>
    %4 = vector.broadcast %2 : vector<1x16xf32> to vector<128x16xf32>
    %5 = arith.mulf %3, %4 : vector<128x16xf32>
    %6 = arith.addf %1, %5 : vector<128x16xf32>
    %7 = arith.truncf %6 : vector<128x16xf32> to vector<128x16xbf16>
    %c0_5 = arith.constant 0 : index
    %c0_6 = arith.constant 0 : index
    %8 = vector.load %arg4[%c0_5, %c0_6] : memref<16x33xbf16, #tpu.memory_space<vmem>>, vector<16x33xbf16>
    %cst = arith.constant dense<0.000000e+00> : vector<128x33xf32>
    %9 = tpu.matmul %7, %8, %cst {dimension_numbers = #tpu.dot_dimension_numbers<[1], [0], [0], [1], [0, 0, 1, 1], [], []>} : vector<128x16xbf16>, vector<16x33xbf16>, vector<128x33xf32> -> vector<128x33xf32>
    %10 = vector.extract_strided_slice %9 {offsets = [0, 0], sizes = [128, 16], strides = [1, 1]} : vector<128x33xf32> to vector<128x16xf32>
    %11 = arith.truncf %10 : vector<128x16xf32> to vector<128x16xbf16>
    %12 = vector.extract_strided_slice %9 {offsets = [0, 16], sizes = [128, 16], strides = [1, 1]} : vector<128x33xf32> to vector<128x16xf32>
    %13 = arith.truncf %12 : vector<128x16xf32> to vector<128x16xbf16>
    %14 = vector.extract_strided_slice %9 {offsets = [0, 32], sizes = [128, 1], strides = [1, 1]} : vector<128x33xf32> to vector<128x1xf32>
    "tpu.trace_start"() <{level = 10 : i32, message = "md,nd->mn"}> : () -> ()
    %cst_7 = arith.constant dense<0.000000e+00> : vector<128x128xf32>
    %15 = tpu.matmul %11, %13, %cst_7 {dimension_numbers = #tpu.dot_dimension_numbers<[1], [1], [0], [0], [0, 0, 1, 0], [], []>} : vector<128x16xbf16>, vector<128x16xbf16>, vector<128x128xf32> -> vector<128x128xf32>
    "tpu.trace_stop"() : () -> ()
    %c0_8 = arith.constant 0 : index
    %c0_9 = arith.constant 0 : index
    %16 = vector.load %arg5[%c0_8, %c0_9] : memref<128x128xf32, #tpu.memory_space<vmem>>, vector<128x128xf32>
    %17 = arith.addf %15, %16 : vector<128x128xf32>
    %cst_10 = arith.constant dense<0xFF800000> : vector<128xf32>
    %18 = vector.multi_reduction <maximumf>, %17, %cst_10 [1] : vector<128x128xf32> to vector<128xf32>
    %19 = vector.shape_cast %18 : vector<128xf32> to vector<128x1xf32>
    %20 = vector.broadcast %19 : vector<128x1xf32> to vector<128x128xf32>
    %21 = arith.subf %17, %20 : vector<128x128xf32>
    %22 = math.exp %21 : vector<128x128xf32>
    %cst_11 = arith.constant dense<0.000000e+00> : vector<128xf32>
    %23 = vector.multi_reduction <add>, %22, %cst_11 [1] : vector<128x128xf32> to vector<128xf32>
    %24 = vector.shape_cast %23 : vector<128xf32> to vector<128x1xf32>
    %cst_12 = arith.constant dense<0.000000e+00> : vector<128x1xf32>
    %25 = tpu.matmul %22, %14, %cst_12 {dimension_numbers = #tpu.dot_dimension_numbers<[1], [0], [0], [1], [0, 0, 1, 1], [], []>} : vector<128x128xf32>, vector<128x1xf32>, vector<128x1xf32> -> vector<128x1xf32>
    %26 = tpu.reciprocal %24 {approx = true} : vector<128x1xf32> -> vector<128x1xf32>
    %27 = arith.mulf %25, %26 : vector<128x1xf32>
    %c0_13 = arith.constant 0 : index
    %c0_14 = arith.constant 0 : index
    %28 = memref.load %arg6[%c0_13, %c0_14] : memref<1x1xf32, #tpu.memory_space<smem>>
    %29 = vector.broadcast %28 : f32 to vector<128x1xf32>
    %30 = arith.addf %27, %29 : vector<128x1xf32>
    %31 = vector.shape_cast %30 : vector<128x1xf32> to vector<1x1x128xf32>
    %c0_15 = arith.constant 0 : index
    %c0_16 = arith.constant 0 : index
    %c0_17 = arith.constant 0 : index
    %32 = vector.load %arg7[%c0_15, %c0_16, %c0_17] : memref<1x1x128xf32, #tpu.memory_space<vmem>>, vector<1x1x128xf32>
    tpu.vector_store %arg7[%c0_15, %c0_16, %c0_17], %31 {strides = array<i32>} : memref<1x1x128xf32, #tpu.memory_space<vmem>>, vector<1x1x128xf32>,
    return
  }
  func.func @transform_0(%arg0: i32) -> (i32, i32) {
    %c0_i32 = arith.constant 0 : i32
    %c0_i32_0 = arith.constant 0 : i32
    return %arg0, %c0_i32 : i32, i32
  }
  func.func @transform_1(%arg0: i32) -> (i32, i32) {
    %c0_i32 = arith.constant 0 : i32
    %c0_i32_0 = arith.constant 0 : i32
    %c0_i32_1 = arith.constant 0 : i32
    return %c0_i32, %c0_i32_0 : i32, i32
  }
  func.func @transform_2(%arg0: i32) -> (i32, i32) {
    %c0_i32 = arith.constant 0 : i32
    %c0_i32_0 = arith.constant 0 : i32
    %c0_i32_1 = arith.constant 0 : i32
    return %c0_i32, %c0_i32_0 : i32, i32
  }
  func.func @transform_3(%arg0: i32) -> (i32, i32) {
    %c0_i32 = arith.constant 0 : i32
    %c0_i32_0 = arith.constant 0 : i32
    %c0_i32_1 = arith.constant 0 : i32
    return %c0_i32, %c0_i32_0 : i32, i32
  }
  func.func @transform_4(%arg0: i32) -> (i32, i32) {
    %c0_i32 = arith.constant 0 : i32
    %c0_i32_0 = arith.constant 0 : i32
    %c0_i32_1 = arith.constant 0 : i32
    return %c0_i32, %c0_i32_0 : i32, i32
  }
  func.func @transform_5(%arg0: i32) -> (i32, i32) {
    %c0_i32 = arith.constant 0 : i32
    %c0_i32_0 = arith.constant 0 : i32
    %c0_i32_1 = arith.constant 0 : i32
    return %c0_i32, %c0_i32_0 : i32, i32
  }
  func.func @transform_6(%arg0: i32) -> (i32, i32, i32) {
    %c0_i32 = arith.constant 0 : i32
    %c0_i32_0 = arith.constant 0 : i32
    %c0_i32_1 = arith.constant 0 : i32
    return %arg0, %c0_i32, %c0_i32_0 : i32, i32, i32
  }
}

</mosaic_0001>

<bundles_post_ra>
// kernel: attention_forward.1
= control target key start
LH: loop header
LB: loop body
LE: loop exit
PB: predicated region body
PF: predicated region fallthrough
CT: control target
= control target key end

     0   :  { %v1318_v0 = vmov 0   ;;  %vm192_vm0 = vcmask 130048   ;;  %s1320_s12 = smov 96   ;;  %vm953_vm1 = vcmask 130112   ;;  %vm960_vm2 = vcmask 195712   ;;  %s1732_s0 = inlined_call_operand.vmem [shape: f32[128,1], index: 0, kind: input, shape index: {}]   ;;  %s1733_s3 = inlined_call_operand.vmem [shape: bf16[16,33], index: 3, kind: input, shape index: {}]   ;;  %s1734_s2 = inlined_call_operand.vmem [shape: f32[1,16], index: 2, kind: input, shape index: {}]   ;;  %s1735_s1 = inlined_call_operand.vmem [shape: f32[128,16], index: 1, kind: input, shape index: {}]   ;;  %s1736_s4 = inlined_call_operand.vmem [shape: f32[128,128], index: 4, kind: input, shape index: {}]   ;;  %s1737_s5 = inlined_call_operand.<no memory space> [shape: f32[1,1], index: 5, kind: input, shape index: {}]   ;;  %s1738_s6 = inlined_call_operand.vmem [shape: f32[1,1,128], index: 6, kind: output, shape index: {}]  }
   0x1   :  { %1252 = vset.pattern.permute.xlu1 %v1318_v0  ;;  %1251 = vset.pattern.permute.xlu0 %v1318_v0  ;;  %v27_v1 = vld [vmem:[%s1732_s0 + $0x10] sm:$0xff]  ;;  %v25_v2 = vld [vmem:[%s1732_s0] sm:$0xff]  ;;  %v28_v3 = vld [vmem:[%s1732_s0 + $0x18] sm:$0xff]  ;;  %vm967_vm3 = vcmask 261312   ;;  %vm974_vm4 = vcmask 326912   ;;  %vm981_vm5 = vcmask 392512  }
   0x2   :  { %70 = vperm.xlu1 %1252, %v27_v1   ;;  %60 = vperm.xlu0 %1251, %v25_v2   ;;  %v26_v4 = vld [vmem:[%s1732_s0 + $0x8] sm:$0xff]  ;;  %v29_v6 = vld [vmem:[%s1732_s0 + $0x20] sm:$0xff]  ;;  %v32_v8 = vld [vmem:[%s1732_s0 + $0x38] sm:$0xff]  ;;  %vm988_vm6 = vcmask 458112   ;;  %vm995_vm7 = vcmask 523712   ;;  %vm1002_vm8 = vcmask 589312  }
   0x3   :  { %v30_v5 = vld [vmem:[%s1732_s0 + $0x28] sm:$0xff]  ;;  %v1253_v7 = vld [vmem:[%s1733_s3] sm:$0xff]   ;;  %v31_v9 = vld [vmem:[%s1732_s0 + $0x30] sm:$0xff]  ;;  %vm1009_vm9 = vcmask 654912   ;;  %vm1016_vm10 = vcmask 720512   ;;  %vm1023_vm11 = vcmask 786112  }
   0x4   :  { %1134 = vmatprep.subr.bf16.mxu0 %v1253_v7  ;;  %v34_v10 = vld [vmem:[%s1732_s0 + $0x48] sm:$0xff]  ;;  %v33_v11 = vld [vmem:[%s1732_s0 + $0x40] sm:$0xff]  ;;  %v36_v12 = vld [vmem:[%s1732_s0 + $0x58] sm:$0xff]  ;;  %vm1030_vm12 = vcmask 851712   ;;  %vm1037_vm13 = vcmask 917312   ;;  %vm1044_vm14 = vcmask 982912  }
   0x5   :  { %1135 = vmatpush3.bf16.msra.mxu0 %v1253_v7  ;;  %v35_v13 = vld [vmem:[%s1732_s0 + $0x50] sm:$0xff]  ;;  %v38_v14 = vld [vmem:[%s1732_s0 + $0x68] sm:$0xff]  ;;  %v37_v15 = vld [vmem:[%s1732_s0 + $0x60] sm:$0xff]  ;;  %vm1051_vm15 = vcmask 1048512  }
   0x6   :  { %75 = vperm.xlu1 %1252, %v28_v3   ;;  %65 = vperm.xlu0 %1251, %v26_v4   ;;  %v40_v16 = vld [vmem:[%s1732_s0 + $0x78] sm:$0xff]  ;;  %v39_v17 = vld [vmem:[%s1732_s0 + $0x70] sm:$0xff]  ;;  %v1410_v18 = vld [vmem:[%s1734_s2] ss:$0 sm:$0xff] }
   0x7   :  { %v43_v21 = vld [vmem:[%s1735_s1 + $0x10] sm:$0xff]  ;;  %v41_v24 = vld [vmem:[%s1735_s1] sm:$0xff]  ;;  %v44_v25 = vld [vmem:[%s1735_s1 + $0x18] sm:$0xff] }
   0x8   :  { %v42_v27 = vld [vmem:[%s1735_s1 + $0x8] sm:$0xff]  ;;  %v45_v37 = vld [vmem:[%s1735_s1 + $0x20] sm:$0xff]  ;;  %v48_v45 = vld [vmem:[%s1735_s1 + $0x38] sm:$0xff] }
   0x9   :  { %v46_v35 = vld [vmem:[%s1735_s1 + $0x28] sm:$0xff]  ;;  %v47_v47 = vld [vmem:[%s1735_s1 + $0x30] sm:$0xff]  ;;  %v49_v56 = vld [vmem:[%s1735_s1 + $0x40] sm:$0xff] }
   0xa   :  { %85 = vperm.xlu1 %1252, %v30_v5   ;;  %80 = vperm.xlu0 %1251, %v29_v6   ;;  %v50_v54 = vld [vmem:[%s1735_s1 + $0x48] sm:$0xff]  ;;  %v52_v63 = vld [vmem:[%s1735_s1 + $0x58] sm:$0xff]  ;;  %v51_v1 = vld [vmem:[%s1735_s1 + $0x50] sm:$0xff] }
   0xe   :  { %95 = vperm.xlu1 %1252, %v32_v8   ;;  %90 = vperm.xlu0 %1251, %v31_v9   ;;  %v54_v8 = vld [vmem:[%s1735_s1 + $0x68] sm:$0xff] }
  0x12   :  { %105 = vperm.xlu1 %1252, %v34_v10   ;;  %100 = vperm.xlu0 %1251, %v33_v11   ;;  %v53_v10 = vld [vmem:[%s1735_s1 + $0x60] sm:$0xff] }
  0x16   :  { %115 = vperm.xlu1 %1252, %v36_v12   ;;  %110 = vperm.xlu0 %1251, %v35_v13  }
  0x1a   :  { %125 = vperm.xlu1 %1252, %v38_v14   ;;  %120 = vperm.xlu0 %1251, %v37_v15  }
  0x1e   :  { %135 = vperm.xlu1 %1252, %v40_v16   ;;  %130 = vperm.xlu0 %1251, %v39_v17   ;;  %v56_v17 = vld [vmem:[%s1735_s1 + $0x78] sm:$0xff] }
  0x7d   :  { %v71_v19 = vpop.permute.xlu1 %70  ;;  %v61_v20 = vpop.permute.xlu0 %60 }
  0x7e   :  { %v146_v22 = vmul.f32 %v1410_v18, %v71_v19  ;;  %v144_v23 = vmul.f32 %v1410_v18, %v61_v20  ;;  %v55_v20 = vld [vmem:[%s1735_s1 + $0x70] sm:$0xff]  ;;  %s1319_s1 = smov 112  }
  0x80   :  { %v162_v31 = vadd.f32 %v146_v22, %v43_v21  ;;  %v160_v32 = vadd.f32 %v144_v23, %v41_v24 }
  0x81   :  { %v76_v26 = vpop.permute.xlu1 %75  ;;  %v66_v28 = vpop.permute.xlu0 %65 }
  0x82   :  { %v147_v29 = vmul.f32 %v1410_v18, %v76_v26  ;;  %v145_v30 = vmul.f32 %v1410_v18, %v66_v28 }
  0x84   :  { %v163_v33 = vadd.f32 %v147_v29, %v44_v25  ;;  %v161_v34 = vadd.f32 %v145_v30, %v42_v27 }
  0x85   :  { %v86_v36 = vpop.permute.xlu1 %85  ;;  %v81_v38 = vpop.permute.xlu0 %80 }
  0x86   :  { %v177_v39 = vpack.c.bf16 %v163_v33, %v162_v31  ;;  %v149_v40 = vmul.f32 %v1410_v18, %v86_v36  ;;  %v148_v41 = vmul.f32 %v1410_v18, %v81_v38  ;;  %v176_v42 = vpack.c.bf16 %v161_v34, %v160_v32 }
  0x88   :  { %v165_v43 = vadd.f32 %v149_v40, %v46_v35  ;;  %v164_v44 = vadd.f32 %v148_v41, %v45_v37  ;;  %1136 = vmatprep.mubr.msk.bf16.mxu0 %vm192_vm0, %v176_v42 }
  0x89   :  { %v96_v46 = vpop.permute.xlu1 %95  ;;  %1137 = vmatmul.mubr.msk.bf16.vlgmr.msra.gmra.mxu0 %vm192_vm0, %v177_v39  ;;  %v91_v48 = vpop.permute.xlu0 %90 }
  0x8a   :  { %v178_v49 = vpack.c.bf16 %v165_v43, %v164_v44  ;;  %v151_v50 = vmul.f32 %v1410_v18, %v96_v46  ;;  %v150_v51 = vmul.f32 %v1410_v18, %v91_v48 }
  0x8c   :  { %v167_v52 = vadd.f32 %v151_v50, %v48_v45  ;;  %v166_v53 = vadd.f32 %v150_v51, %v47_v47  ;;  %1140 = vmatprep.mubr.msk.bf16.mxu0 %vm192_vm0, %v178_v49 }
  0x8d   :  { %v106_v55 = vpop.permute.xlu1 %105  ;;  %v101_v57 = vpop.permute.xlu0 %100 }
  0x8e   :  { %v179_v58 = vpack.c.bf16 %v167_v52, %v166_v53  ;;  %v153_v59 = vmul.f32 %v1410_v18, %v106_v55  ;;  %v152_v60 = vmul.f32 %v1410_v18, %v101_v57 }
  0x90   :  { %v169_v61 = vadd.f32 %v153_v59, %v50_v54  ;;  %v168_v62 = vadd.f32 %v152_v60, %v49_v56 }
  0x91   :  { %v116_v0 = vpop.permute.xlu1 %115  ;;  %1141 = vmatmul.mubr.msk.bf16.gmra.mxu0 %vm192_vm0, %v179_v58  ;;  %v111_v2 = vpop.permute.xlu0 %110 }
  0x92   :  { %v180_v3 = vpack.c.bf16 %v169_v61, %v168_v62  ;;  %v155_v4 = vmul.f32 %v1410_v18, %v116_v0  ;;  %v154_v5 = vmul.f32 %v1410_v18, %v111_v2 }
  0x94   :  { %v171_v6 = vadd.f32 %v155_v4, %v52_v63  ;;  %v170_v7 = vadd.f32 %v154_v5, %v51_v1  ;;  %1144 = vmatprep.mubr.msk.bf16.mxu0 %vm192_vm0, %v180_v3 }
  0x95   :  { %v126_v9 = vpop.permute.xlu1 %125  ;;  %v121_v11 = vpop.permute.xlu0 %120 }
  0x96   :  { %v181_v12 = vpack.c.bf16 %v171_v6, %v170_v7  ;;  %v157_v13 = vmul.f32 %v1410_v18, %v126_v9  ;;  %v156_v14 = vmul.f32 %v1410_v18, %v121_v11 }
  0x98   :  { %v173_v15 = vadd.f32 %v157_v13, %v54_v8  ;;  %v172_v16 = vadd.f32 %v156_v14, %v53_v10 }
  0x99   :  { %v136_v19 = vpop.permute.xlu1 %135  ;;  %1145 = vmatmul.mubr.msk.bf16.gmra.mxu0 %vm192_vm0, %v181_v12  ;;  %v131_v21 = vpop.permute.xlu0 %130 }
  0x9a   :  { %v182_v22 = vpack.c.bf16 %v173_v15, %v172_v16  ;;  %v159_v23 = vmul.f32 %v1410_v18, %v136_v19  ;;  %v158_v24 = vmul.f32 %v1410_v18, %v131_v21 }
  0x9c   :  { %v175_v25 = vadd.f32 %v159_v23, %v56_v17  ;;  %v174_v26 = vadd.f32 %v158_v24, %v55_v20  ;;  %1148 = vmatprep.mubr.msk.bf16.mxu0 %vm192_vm0, %v182_v22  ;;  %v324_v17 = vld [vmem:[%s1736_s4 + $0x10] sm:$0xff]  ;;  %v322_v22 = vld [vmem:[%s1736_s4] sm:$0xff]  ;;  %v325_v23 = vld [vmem:[%s1736_s4 + $0x18] sm:$0xff] }
  0x9e   :  { %v183_v27 = vpack.c.bf16 %v175_v25, %v174_v26 }
  0xa1   :  { %1149 = vmatmul.mubr.msk.bf16.gmra.mxu0 %vm192_vm0, %v183_v27 }
 0x149   :  { %v1138_v28 = vpop.f32.mrf.mxu0 }
 0x14b   :  { %v1484_v29 = vpop.f32.mrf.mxu0 }
 0x14d   :  { %v1139_v30 = vpop.f32.mrf.mxu0 }
 0x14e   :  { %v1508_v50 = vpack.c.bf16 %v1139_v30, %v1138_v28 }
 0x14f   :  { %v1486_v31 = vpop.f32.mrf.mxu0 }
 0x150   :  { %v314_v32 = vpack.c.bf16 %v1486_v31, %v1484_v29 }
 0x151   :  { %v1142_v33 = vpop.f32.mrf.mxu0 }
 0x152   :  { %1168 = vmatprep.mubr.msk.bf16.mxu1 %vm192_vm0, %v314_v32 }
 0x153   :  { %v267_v18 = vpop.f32.mrf.mxu0 }
 0x155   :  { %v1143_v34 = vpop.f32.mrf.mxu0 }
 0x156   :  { %v1502_v48 = vpack.c.bf16 %v1143_v34, %v1142_v33 }
 0x157   :  { %v270_v35 = vpop.f32.mrf.mxu0 }
 0x158   :  { %v1505_v49 = vpack.c.bf16 %v270_v35, %v267_v18 }
 0x159   :  { %v1146_v36 = vpop.f32.mrf.mxu0 }
 0x15b   :  { %v283_v37 = vpop.f32.mrf.mxu0 }
 0x15d   :  { %v1147_v38 = vpop.f32.mrf.mxu0 }
 0x15e   :  { %v1496_v46 = vpack.c.bf16 %v1147_v38, %v1146_v36 }
 0x15f   :  { %v286_v39 = vpop.f32.mrf.mxu0 }
 0x160   :  { %v1499_v47 = vpack.c.bf16 %v286_v39, %v283_v37 }
 0x161   :  { %v1150_v40 = vpop.f32.mrf.mxu0 }
 0x163   :  { %v299_v41 = vpop.f32.mrf.mxu0 }
 0x165   :  { %v1151_v42 = vpop.f32.mrf.mxu0 }
 0x166   :  { %v1491_v43 = vpack.c.bf16 %v1151_v42, %v1150_v40 }
 0x167   :  { %v302_v44 = vpop.f32.mrf.mxu0 }
 0x168   :  { %v1493_v45 = vpack.c.bf16 %v302_v44, %v299_v41  ;;  %360 = vrot.lane.b32.xlu0 %v1491_v43, %s1319_s1 }
 0x16a   :  { %358 = vrot.lane.b32.xlu1 %v1493_v45, %s1319_s1 }
 0x16c   :  { %356 = vrot.lane.b32.xlu0 %v1496_v46, %s1319_s1 }
 0x16e   :  { %354 = vrot.lane.b32.xlu1 %v1499_v47, %s1319_s1 }
 0x170   :  { %352 = vrot.lane.b32.xlu0 %v1502_v48, %s1319_s1 }
 0x172   :  { %350 = vrot.lane.b32.xlu1 %v1505_v49, %s1319_s1 }
 0x174   :  { %348 = vrot.lane.b32.xlu0 %v1508_v50, %s1319_s1 }
 0x176   :  { %346 = vrot.lane.b32.xlu1 %v314_v32, %s1319_s1 }
 0x178   :  { %665 = vrot.lane.b32.xlu0 %v1151_v42, %s1320_s12  ;;  %v332_v42 = vld [vmem:[%s1736_s4 + $0x50] sm:$0xff] }
 0x17a   :  { %661 = vrot.lane.b32.xlu1 %v302_v44, %s1320_s12 }
 0x17c   :  { %663 = vrot.lane.b32.xlu0 %v1150_v40, %s1320_s12 }
 0x17e   :  { %657 = vrot.lane.b32.xlu1 %v1147_v38, %s1320_s12 }
 0x180   :  { %659 = vrot.lane.b32.xlu0 %v299_v41, %s1320_s12  ;;  %v327_v41 = vld [vmem:[%s1736_s4 + $0x28] sm:$0xff] }
 0x182   :  { %653 = vrot.lane.b32.xlu1 %v286_v39, %s1320_s12 }
 0x184   :  { %655 = vrot.lane.b32.xlu0 %v1146_v36, %s1320_s12  ;;  %v329_v36 = vld [vmem:[%s1736_s4 + $0x38] sm:$0xff] }
 0x186   :  { %649 = vrot.lane.b32.xlu1 %v1143_v34, %s1320_s12 }
 0x188   :  { %651 = vrot.lane.b32.xlu0 %v283_v37, %s1320_s12 }
 0x18a   :  { %645 = vrot.lane.b32.xlu1 %v270_v35, %s1320_s12  ;;  %v326_v35 = vld [vmem:[%s1736_s4 + $0x20] sm:$0xff] }
 0x18c   :  { %647 = vrot.lane.b32.xlu0 %v1142_v33, %s1320_s12 }
 0x18e   :  { %641 = vrot.lane.b32.xlu1 %v1139_v30, %s1320_s12  ;;  %v328_v30 = vld [vmem:[%s1736_s4 + $0x30] sm:$0xff] }
 0x190   :  { %643 = vrot.lane.b32.xlu0 %v267_v18, %s1320_s12 }
 0x194   :  { %639 = vrot.lane.b32.xlu0 %v1138_v28, %s1320_s12  ;;  %v323_v28 = vld [vmem:[%s1736_s4 + $0x8] sm:$0xff] }
 0x1da   :  { %v361_v51 = vpop.permute.xlu0 %360 }
 0x1db   :  { %1240 = vmatprep.subr.msk.bf16.mxu1 %vm192_vm0, %v361_v51  ;;  %v408_v52 = vsel %vm192_vm0, %v361_v51, 0 }
 0x1dc   :  { %1153 = vmatpush3.bf16.xpose.msra.mxu1 %v408_v52  ;;  %v359_v53 = vpop.permute.xlu1 %358 }
 0x1dd   :  { %1241 = vmatprep.subr.msk.bf16.mxu1 %vm192_vm0, %v359_v53  ;;  %v405_v57 = vsel %vm192_vm0, %v359_v53, 0  ;;  %v331_v53 = vld [vmem:[%s1736_s4 + $0x48] sm:$0xff] }
 0x1de   :  { %v357_v54 = vpop.permute.xlu0 %356 }
 0x1df   :  { %v402_v62 = vsel %vm192_vm0, %v357_v54, 0 }
 0x1e0   :  { %v355_v55 = vpop.permute.xlu1 %354 }
 0x1e1   :  { %v399_v3 = vsel %vm192_vm0, %v355_v55, 0 }
 0x1e2   :  { %v353_v56 = vpop.permute.xlu0 %352 }
 0x1e3   :  { %v396_v8 = vsel %vm192_vm0, %v353_v56, 0 }
 0x1e4   :  { %1155 = vmatpush3.bf16.xpose.msra.mxu1 %v405_v57  ;;  %v351_v58 = vpop.permute.xlu1 %350  ;;  %v337_v57 = vld [vmem:[%s1736_s4 + $0x78] sm:$0xff] }
 0x1e5   :  { %1242 = vmatprep.subr.msk.bf16.mxu1 %vm192_vm0, %v357_v54  ;;  %v393_v12 = vsel %vm192_vm0, %v351_v58, 0 }
 0x1e6   :  { %v349_v59 = vpop.permute.xlu0 %348 }
 0x1e7   :  { %v390_v15 = vsel %vm192_vm0, %v349_v59, 0 }
 0x1e8   :  { %v347_v60 = vpop.permute.xlu1 %346 }
 0x1e9   :  { %v387_v16 = vsel %vm192_vm0, %v347_v60, 0 }
 0x1ea   :  { %v666_v61 = vpop.permute.xlu0 %665 }
 0x1eb   :  { %1184 = vmatprep.subr.mxu0 %v666_v61 }
 0x1ec   :  { %1157 = vmatpush3.bf16.xpose.msra.mxu1 %v402_v62  ;;  %1185 = vmatpush3.msra.mxu0 %v666_v61  ;;  %v662_v63 = vpop.permute.xlu1 %661  ;;  %v335_v61 = vld [vmem:[%s1736_s4 + $0x68] sm:$0xff] }
 0x1ed   :  { %1243 = vmatprep.subr.msk.bf16.mxu1 %vm192_vm0, %v355_v55 }
 0x1ee   :  { %v664_v0 = vpop.permute.xlu0 %663 }
 0x1ef   :  { %1186 = vmatprep.subr.mxu0 %v664_v0 }
 0x1f0   :  { %1187 = vmatpush3.msra.mxu0 %v664_v0  ;;  %v658_v1 = vpop.permute.xlu1 %657 }
 0x1f1   :  { %1188 = vmatprep.subr.mxu0 %v662_v63 }
 0x1f2   :  { %v660_v2 = vpop.permute.xlu0 %659  ;;  %1189 = vmatpush3.msra.mxu0 %v662_v63  ;;  %v334_v63 = vld [vmem:[%s1736_s4 + $0x60] sm:$0xff] }
 0x1f3   :  { %1190 = vmatprep.subr.mxu0 %v660_v2 }
 0x1f4   :  { %1159 = vmatpush3.bf16.xpose.msra.mxu1 %v399_v3  ;;  %1191 = vmatpush3.msra.mxu0 %v660_v2  ;;  %v654_v4 = vpop.permute.xlu1 %653 }
 0x1f5   :  { %1244 = vmatprep.subr.msk.bf16.mxu1 %vm192_vm0, %v353_v56  ;;  %1192 = vmatprep.subr.mxu0 %v658_v1 }
 0x1f6   :  { %v656_v5 = vpop.permute.xlu0 %655  ;;  %1193 = vmatpush3.msra.mxu0 %v658_v1  ;;  %v336_v1 = vld [vmem:[%s1736_s4 + $0x70] sm:$0xff] }
 0x1f7   :  { %1194 = vmatprep.subr.mxu0 %v656_v5 }
 0x1f8   :  { %1195 = vmatpush3.msra.mxu0 %v656_v5  ;;  %v650_v6 = vpop.permute.xlu1 %649 }
 0x1f9   :  { %1196 = vmatprep.subr.mxu0 %v654_v4 }
 0x1fa   :  { %v652_v7 = vpop.permute.xlu0 %651  ;;  %1197 = vmatpush3.msra.mxu0 %v654_v4 }
 0x1fb   :  { %1198 = vmatprep.subr.mxu0 %v652_v7 }
 0x1fc   :  { %1161 = vmatpush3.bf16.xpose.msra.mxu1 %v396_v8  ;;  %1199 = vmatpush3.msra.mxu0 %v652_v7  ;;  %v646_v9 = vpop.permute.xlu1 %645 }
 0x1fd   :  { %1245 = vmatprep.subr.msk.bf16.mxu1 %vm192_vm0, %v351_v58  ;;  %1200 = vmatprep.subr.mxu0 %v650_v6 }
 0x1fe   :  { %v648_v10 = vpop.permute.xlu0 %647  ;;  %1201 = vmatpush3.msra.mxu0 %v650_v6 }
 0x1ff   :  { %1202 = vmatprep.subr.mxu0 %v648_v10 }
 0x200   :  { %1203 = vmatpush3.msra.mxu0 %v648_v10  ;;  %v642_v13 = vpop.permute.xlu1 %641 }
 0x201   :  { %1204 = vmatprep.subr.mxu0 %v646_v9 }
 0x202   :  { %v644_v11 = vpop.permute.xlu0 %643  ;;  %1205 = vmatpush3.msra.mxu0 %v646_v9 }
 0x203   :  { %1206 = vmatprep.subr.mxu0 %v644_v11 }
 0x204   :  { %1163 = vmatpush3.bf16.xpose.msra.mxu1 %v393_v12  ;;  %1207 = vmatpush3.msra.mxu0 %v644_v11 }
 0x205   :  { %1246 = vmatprep.subr.msk.bf16.mxu1 %vm192_vm0, %v349_v59  ;;  %1208 = vmatprep.subr.mxu0 %v642_v13 }
 0x206   :  { %v640_v14 = vpop.permute.xlu0 %639  ;;  %1209 = vmatpush3.msra.mxu0 %v642_v13 }
 0x207   :  { %1210 = vmatprep.subr.mxu0 %v640_v14 }
 0x208   :  { %1211 = vmatpush3.msra.mxu0 %v640_v14 }
 0x20c   :  { %1165 = vmatpush3.bf16.xpose.msra.mxu1 %v390_v15 }
 0x20d   :  { %1247 = vmatprep.subr.msk.bf16.mxu1 %vm192_vm0, %v347_v60 }
 0x214   :  { %1167 = vmatpush3.bf16.xpose.msra.mxu1 %v387_v16 }
 0x21b   :  { %1169 = vmatmul.mubr.msk.bf16.vlgmr.msra.gmra.mxu1 %vm192_vm0, %v1508_v50 }
 0x21c   :  { %1172 = vmatprep.mubr.msk.bf16.mxu1 %vm192_vm0, %v1505_v49 }
 0x223   :  { %1173 = vmatmul.mubr.msk.bf16.gmra.mxu1 %vm192_vm0, %v1502_v48  ;;  %v333_v48 = vld [vmem:[%s1736_s4 + $0x58] sm:$0xff] }
 0x224   :  { %1176 = vmatprep.mubr.msk.bf16.mxu1 %vm192_vm0, %v1499_v47  ;;  %v330_v47 = vld [vmem:[%s1736_s4 + $0x40] sm:$0xff] }
 0x22b   :  { %1177 = vmatmul.mubr.msk.bf16.gmra.mxu1 %vm192_vm0, %v1496_v46 }
 0x22c   :  { %1180 = vmatprep.mubr.msk.bf16.mxu1 %vm192_vm0, %v1493_v45 }
 0x233   :  { %1181 = vmatmul.mubr.msk.bf16.gmra.mxu1 %vm192_vm0, %v1491_v43 }
 0x2db   :  { %v1170_v19 = vpop.f32.mrf.mxu1 }
 0x2dc   :  { %v1559_v20 = vadd.f32 %v1170_v19, %v324_v17 }
 0x2dd   :  { %v444_v21 = vpop.f32.mrf.mxu1 }
 0x2de   :  { %511 = vmax.xlane.f32.xlu1 %v1559_v20  ;;  %v1568_v25 = vadd.f32 %v444_v21, %v322_v22 }
 0x2df   :  { %v1171_v24 = vpop.f32.mrf.mxu1 }
 0x2e0   :  { %v1570_v26 = vadd.f32 %v1171_v24, %v325_v23 }
 0x2e1   :  { %v447_v27 = vpop.f32.mrf.mxu1 }
 0x2e2   :  { %513 = vmax.xlane.f32.xlu0 %v1570_v26  ;;  %507 = vmax.xlane.f32.xlu1 %v1568_v25  ;;  %v1580_v33 = vadd.f32 %v447_v27, %v323_v28 }
 0x2e3   :  { %v1174_v32 = vpop.f32.mrf.mxu1 }
 0x2e4   :  { %v1582_v18 = vadd.f32 %v1174_v32, %v328_v30 }
 0x2e5   :  { %v460_v34 = vpop.f32.mrf.mxu1 }
 0x2e6   :  { %509 = vmax.xlane.f32.xlu0 %v1580_v33  ;;  %519 = vmax.xlane.f32.xlu1 %v1582_v18  ;;  %v1592_v38 = vadd.f32 %v460_v34, %v326_v35 }
 0x2e7   :  { %v1175_v37 = vpop.f32.mrf.mxu1 }
 0x2e8   :  { %v1594_v39 = vadd.f32 %v1175_v37, %v329_v36 }
 0x2e9   :  { %v463_v40 = vpop.f32.mrf.mxu1 }
 0x2ea   :  { %521 = vmax.xlane.f32.xlu0 %v1594_v39  ;;  %515 = vmax.xlane.f32.xlu1 %v1592_v38  ;;  %v1604_v44 = vadd.f32 %v463_v40, %v327_v41 }
 0x2eb   :  { %v1178_v43 = vpop.f32.mrf.mxu1 }
 0x2ec   :  { %v1606_v45 = vadd.f32 %v1178_v43, %v332_v42 }
 0x2ed   :  { %v476_v46 = vpop.f32.mrf.mxu1 }
 0x2ee   :  { %517 = vmax.xlane.f32.xlu0 %v1604_v44  ;;  %527 = vmax.xlane.f32.xlu1 %v1606_v45  ;;  %v1616_v50 = vadd.f32 %v476_v46, %v330_v47 }
 0x2ef   :  { %v1179_v49 = vpop.f32.mrf.mxu1 }
 0x2f0   :  { %v1618_v51 = vadd.f32 %v1179_v49, %v333_v48 }
 0x2f1   :  { %v479_v52 = vpop.f32.mrf.mxu1 }
 0x2f2   :  { %529 = vmax.xlane.f32.xlu0 %v1618_v51  ;;  %523 = vmax.xlane.f32.xlu1 %v1616_v50  ;;  %v1625_v55 = vadd.f32 %v479_v52, %v331_v53 }
 0x2f3   :  { %v1182_v54 = vpop.f32.mrf.mxu1 }
 0x2f4   :  { %v1653_v2 = vadd.f32 %v1182_v54, %v336_v1 }
 0x2f5   :  { %v492_v56 = vpop.f32.mrf.mxu1 }
 0x2f6   :  { %525 = vmax.xlane.f32.xlu0 %v1625_v55  ;;  %v1647_v0 = vadd.f32 %v492_v56, %v334_v63 }
 0x2f7   :  { %v1183_v58 = vpop.f32.mrf.mxu1 }
 0x2f8   :  { %v1631_v59 = vadd.f32 %v1183_v58, %v337_v57 }
 0x2f9   :  { %v495_v60 = vpop.f32.mrf.mxu1 }
 0x2fa   :  { %537 = vmax.xlane.f32.xlu0 %v1631_v59  ;;  %v1637_v62 = vadd.f32 %v495_v60, %v335_v61 }
 0x2fe   :  { %533 = vmax.xlane.f32.xlu0 %v1637_v62 }
 0x303   :  { %637 = vrot.lane.b32.xlu1 %v1486_v31, %s1320_s12 }
 0x314   :  { %635 = vrot.lane.b32.xlu0 %v1484_v29, %s1320_s12 }
 0x327   :  { %531 = vmax.xlane.f32.xlu1 %v1647_v0 }
 0x32b   :  { %535 = vmax.xlane.f32.xlu1 %v1653_v2 }
 0x367   :  { %v512_v31 = vpop.xlane.xlu1 %511 }
 0x368   :  { %v541_v3 = vsub.f32 %v1559_v20, %v512_v31 }
 0x36a   :  { %v559_v29 = vmul.f32 1.442695, %v541_v3 }
 0x36b   :  { %v514_v4 = vpop.xlane.xlu0 %513  ;;  %v508_v5 = vpop.xlane.xlu1 %507 }
 0x36c   :  { %1254 = vpow2.f32 %v559_v29  ;;  %v542_v6 = vsub.f32 %v1570_v26, %v514_v4  ;;  %v539_v7 = vsub.f32 %v1568_v25, %v508_v5 }
 0x36e   :  { %v555_v8 = vmul.f32 1.442695, %v539_v7  ;;  %v561_v11 = vmul.f32 1.442695, %v542_v6 }
 0x36f   :  { %v510_v9 = vpop.xlane.xlu0 %509  ;;  %v520_v10 = vpop.xlane.xlu1 %519 }
 0x370   :  { %v545_v12 = vsub.f32 %v1582_v18, %v520_v10  ;;  %1256 = vpow2.f32 %v555_v8  ;;  %v540_v13 = vsub.f32 %v1580_v33, %v510_v9 }
 0x371   :  { %1258 = vpow2.f32 %v561_v11 }
 0x372   :  { %v567_v14 = vmul.f32 1.442695, %v545_v12  ;;  %v557_v17 = vmul.f32 1.442695, %v540_v13 }
 0x373   :  { %v522_v15 = vpop.xlane.xlu0 %521  ;;  %v516_v16 = vpop.xlane.xlu1 %515 }
 0x374   :  { %1260 = vpow2.f32 %v567_v14  ;;  %v543_v19 = vsub.f32 %v1592_v38, %v516_v16  ;;  %v546_v23 = vsub.f32 %v1594_v39, %v522_v15  ;;  %v1675_v16 = vstv %s1737_s5 }
 0x375   :  { %1262 = vpow2.f32 %v557_v17 }
 0x376   :  { %v563_v24 = vmul.f32 1.442695, %v543_v19  ;;  %v569_v27 = vmul.f32 1.442695, %v546_v23 }
 0x377   :  { %v518_v20 = vpop.xlane.xlu0 %517  ;;  %v528_v21 = vpop.xlane.xlu1 %527 }
 0x378   :  { %1264 = vpow2.f32 %v563_v24  ;;  %v544_v28 = vsub.f32 %v1604_v44, %v518_v20  ;;  %v549_v35 = vsub.f32 %v1606_v45, %v528_v21 }
 0x379   :  { %v1255_v22 = vpop.eup %1254  ;;  %1266 = vpow2.f32 %v569_v27 }
 0x37a   :  { %591 = vadd.xlane.f32.xlu1 %v1255_v22  ;;  %v565_v34 = vmul.f32 1.442695, %v544_v28  ;;  %v575_v38 = vmul.f32 1.442695, %v549_v35 }
 0x37b   :  { %v530_v25 = vpop.xlane.xlu0 %529  ;;  %v524_v26 = vpop.xlane.xlu1 %523 }
 0x37c   :  { %1268 = vpow2.f32 %v565_v34  ;;  %v547_v39 = vsub.f32 %v1616_v50, %v524_v26  ;;  %v550_v43 = vsub.f32 %v1618_v51, %v530_v25 }
 0x37d   :  { %v1257_v30 = vpop.eup %1256  ;;  %1270 = vpow2.f32 %v575_v38 }
 0x37e   :  { %587 = vadd.xlane.f32.xlu1 %v1257_v30  ;;  %1216 = vmatprep.mubr.f32.mxu0 %v1257_v30  ;;  %v1259_v18 = vpop.eup %1258  ;;  %v571_v44 = vmul.f32 1.442695, %v547_v39  ;;  %v577_v48 = vmul.f32 1.442695, %v550_v43 }
 0x37f   :  { %v526_v32 = vpop.xlane.xlu0 %525  ;;  %v638_v33 = vpop.permute.xlu1 %637 }
 0x380   :  { %1212 = vmatprep.subr.mxu0 %v638_v33  ;;  %v548_v42 = vsub.f32 %v1625_v55, %v526_v32  ;;  %1272 = vpow2.f32 %v571_v44 }
 0x381   :  { %1213 = vmatpush3.msra.mxu0 %v638_v33  ;;  %v1261_v36 = vpop.eup %1260 }
 0x382   :  { %593 = vadd.xlane.f32.xlu1 %v1259_v18  ;;  %599 = vadd.xlane.f32.xlu0 %v1261_v36  ;;  %v1263_v40 = vpop.eup %1262  ;;  %v573_v47 = vmul.f32 1.442695, %v548_v42 }
 0x383   :  { %v538_v37 = vpop.xlane.xlu0 %537 }
 0x384   :  { %1274 = vpow2.f32 %v573_v47  ;;  %v554_v60 = vsub.f32 %v1631_v59, %v538_v37 }
 0x385   :  { %v1265_v46 = vpop.eup %1264  ;;  %1276 = vpow2.f32 %v577_v48 }
 0x386   :  { %589 = vadd.xlane.f32.xlu1 %v1263_v40  ;;  %v1267_v49 = vpop.eup %1266  ;;  %v585_v31 = vmul.f32 1.442695, %v554_v60 }
 0x387   :  { %v534_v41 = vpop.xlane.xlu0 %533 }
 0x388   :  { %v552_v55 = vsub.f32 %v1637_v62, %v534_v41 }
 0x389   :  { %v1269_v50 = vpop.eup %1268 }
 0x38a   :  { %595 = vadd.xlane.f32.xlu1 %v1265_v46  ;;  %v1271_v51 = vpop.eup %1270  ;;  %v581_v58 = vmul.f32 1.442695, %v552_v55 }
 0x38b   :  { %v636_v45 = vpop.permute.xlu0 %635 }
 0x38c   :  { %1214 = vmatprep.subr.mxu0 %v636_v45 }
 0x38d   :  { %1215 = vmatpush3.msra.mxu0 %v636_v45  ;;  %v1273_v52 = vpop.eup %1272 }
 0x38e   :  { %1217 = vmatmul.mubr.f32.vlgmr.msra.gmra.mxu0 %v1263_v40  ;;  %601 = vadd.xlane.f32.xlu1 %v1267_v49 }
 0x38f   :  { %1219 = vmatprep.mubr.f32.mxu0 %v1255_v22 }
 0x391   :  { %v1275_v53 = vpop.eup %1274 }
 0x392   :  { %1220 = vmatmul.mubr.f32.gmra.mxu0 %v1259_v18  ;;  %597 = vadd.xlane.f32.xlu1 %v1269_v50  ;;  %v1277_v54 = vpop.eup %1276 }
 0x393   :  { %1222 = vmatprep.mubr.f32.mxu0 %v1265_v46 }
 0x396   :  { %1223 = vmatmul.mubr.f32.gmra.mxu0 %v1269_v50  ;;  %607 = vadd.xlane.f32.xlu1 %v1271_v51 }
 0x397   :  { %1225 = vmatprep.mubr.f32.mxu0 %v1261_v36 }
 0x39a   :  { %1226 = vmatmul.mubr.f32.gmra.mxu0 %v1267_v49  ;;  %603 = vadd.xlane.f32.xlu1 %v1273_v52 }
 0x39b   :  { %1228 = vmatprep.mubr.f32.mxu0 %v1273_v52 }
 0x39e   :  { %1229 = vmatmul.mubr.f32.gmra.mxu0 %v1275_v53  ;;  %609 = vadd.xlane.f32.xlu1 %v1277_v54 }
 0x39f   :  { %1231 = vmatprep.mubr.f32.mxu0 %v1271_v51 }
 0x3a2   :  { %1232 = vmatmul.mubr.f32.gmra.mxu0 %v1277_v54  ;;  %605 = vadd.xlane.f32.xlu1 %v1275_v53 }
 0x3b0   :  { %v532_v56 = vpop.xlane.xlu1 %531 }
 0x3b1   :  { %v551_v57 = vsub.f32 %v1647_v0, %v532_v56 }
 0x3b3   :  { %v579_v61 = vmul.f32 1.442695, %v551_v57 }
 0x3b4   :  { %v536_v63 = vpop.xlane.xlu1 %535 }
 0x3b5   :  { %1278 = vpow2.f32 %v579_v61  ;;  %v553_v1 = vsub.f32 %v1653_v2, %v536_v63 }
 0x3b6   :  { %1280 = vpow2.f32 %v581_v58 }
 0x3b7   :  { %v583_v3 = vmul.f32 1.442695, %v553_v1 }
 0x3b9   :  { %1282 = vpow2.f32 %v583_v3 }
 0x3ba   :  { %1284 = vpow2.f32 %v585_v31 }
 0x3c2   :  { %v1279_v29 = vpop.eup %1278 }
 0x3c3   :  { %v1281_v4 = vpop.eup %1280  ;;  %611 = vadd.xlane.f32.xlu1 %v1279_v29  ;;  %1234 = vmatprep.mubr.f32.mxu0 %v1279_v29 }
 0x3c4   :  { %1235 = vmatmul.mubr.f32.gmra.mxu0 %v1281_v4 }
 0x3c6   :  { %v1283_v62 = vpop.eup %1282 }
 0x3c7   :  { %613 = vadd.xlane.f32.xlu1 %v1281_v4  ;;  %615 = vadd.xlane.f32.xlu0 %v1283_v62  ;;  %v1285_v0 = vpop.eup %1284 }
 0x3c8   :  { %1237 = vmatprep.mubr.f32.mxu0 %v1283_v62 }
 0x3c9   :  { %1238 = vmatmul.mubr.f32.gmra.mxu0 %v1285_v0 }
 0x3cb   :  { %617 = vadd.xlane.f32.xlu1 %v1285_v0 }
 0x403   :  { %v592_v59 = vpop.xlane.xlu1 %591 }
 0x407   :  { %v588_v5 = vpop.xlane.xlu1 %587 }
 0x40b   :  { %v594_v2 = vpop.xlane.xlu1 %593  ;;  %v600_v13 = vpop.xlane.xlu0 %599 }
 0x40f   :  { %v590_v6 = vpop.xlane.xlu1 %589 }
 0x410   :  { %1286 = vrcp.f32 %v590_v6 }
 0x411   :  { %1288 = vrcp.f32 %v588_v5 }
 0x412   :  { %1290 = vrcp.f32 %v594_v2 }
 0x413   :  { %v596_v7 = vpop.xlane.xlu1 %595  ;;  %1292 = vrcp.f32 %v592_v59 }
 0x414   :  { %1294 = vrcp.f32 %v596_v7 }
 0x417   :  { %v602_v8 = vpop.xlane.xlu1 %601 }
 0x41b   :  { %v598_v9 = vpop.xlane.xlu1 %597 }
 0x41c   :  { %1296 = vrcp.f32 %v598_v9 }
 0x41d   :  { %v1287_v14 = vpop.eup %1286  ;;  %1298 = vrcp.f32 %v600_v13 }
 0x41e   :  { %1300 = vrcp.f32 %v602_v8  ;;  %v1289_v19 = vpop.eup %1288 }
 0x41f   :  { %v608_v10 = vpop.xlane.xlu1 %607  ;;  %v1291_v24 = vpop.eup %1290 }
 0x420   :  { %v1293_v28 = vpop.eup %1292 }
 0x421   :  { %v1295_v34 = vpop.eup %1294 }
 0x423   :  { %v604_v11 = vpop.xlane.xlu1 %603 }
 0x424   :  { %1302 = vrcp.f32 %v604_v11 }
 0x427   :  { %v610_v12 = vpop.xlane.xlu1 %609 }
 0x429   :  { %v1297_v35 = vpop.eup %1296 }
 0x42a   :  { %v1299_v41 = vpop.eup %1298 }
 0x42b   :  { %v606_v20 = vpop.xlane.xlu1 %605  ;;  %v1301_v43 = vpop.eup %1300 }
 0x42c   :  { %1304 = vrcp.f32 %v606_v20 }
 0x42d   :  { %1306 = vrcp.f32 %v608_v10 }
 0x42e   :  { %1308 = vrcp.f32 %v610_v12 }
 0x431   :  { %v1303_v49 = vpop.eup %1302 }
 0x439   :  { %v1305_v51 = vpop.eup %1304 }
 0x43a   :  { %v1307_v57 = vpop.eup %1306 }
 0x43b   :  { %v1309_v60 = vpop.eup %1308 }
 0x44c   :  { %v612_v4 = vpop.xlane.xlu1 %611 }
 0x44e   :  { %v1218_v15 = vpop.f32.mrf.mxu0 }
 0x44f   :  { %v845_v17 = vmul.f32 %v1287_v14, %v1218_v15 }
 0x450   :  { %v749_v21 = vpop.f32.mrf.mxu0  ;;  %v614_v62 = vpop.xlane.xlu1 %613 }
 0x451   :  { %v863_v22 = vadd.f32 %v1675_v16, %v845_v17  ;;  %v844_v23 = vmul.f32 %v1289_v19, %v749_v21  ;;  %1310 = vrcp.f32 %v614_v62  ;;  %v616_v59 = vpop.xlane.xlu0 %615 }
 0x452   :  { %v1221_v25 = vpop.f32.mrf.mxu0  ;;  %1312 = vrcp.f32 %v612_v4 }
 0x453   :  { %v862_v26 = vadd.f32 %v1675_v16, %v844_v23  ;;  %v847_v27 = vmul.f32 %v1291_v24, %v1221_v25  ;;  %898 = vperm.xlu1 %1252, %v863_v22   ;;  %v942_v22 = vlaneseq }
 0x454   :  { %v759_v30 = vpop.f32.mrf.mxu0  ;;  %v618_v0 = vpop.xlane.xlu1 %617 }
 0x455   :  { %v865_v32 = vadd.f32 %v1675_v16, %v847_v27  ;;  %v846_v33 = vmul.f32 %v1293_v28, %v759_v30  ;;  %895 = vperm.xlu0 %1251, %v862_v26   ;;  %1314 = vrcp.f32 %v618_v0  ;;  %v1693_v24 = vand.u32 127, %v942_v22 }
 0x456   :  { %v1224_v18 = vpop.f32.mrf.mxu0  ;;  %1316 = vrcp.f32 %v616_v59  ;;  %v1696_v27 = vshrl.u32 %v942_v22, 7 }
 0x457   :  { %904 = vperm.xlu1 %1252, %v865_v32   ;;  %v864_v37 = vadd.f32 %v1675_v16, %v846_v33  ;;  %v849_v38 = vmul.f32 %v1297_v35, %v1224_v18  ;;  %v955_v26 = vadd.s32 4294967280, %v1693_v24  ;;  %v948_v28 = vadd.s32 4294967288, %v1693_v24 }
 0x458   :  { %v769_v36 = vpop.f32.mrf.mxu0  ;;  %v946_v30 = vsub.s32 %v1693_v24, %v1696_v27  ;;  %v962_v18 = vadd.s32 4294967272, %v1693_v24  ;;  %v969_v35 = vadd.s32 4294967264, %v1693_v24  ;;  %v1011_v62 = vadd.s32 4294967216, %v1693_v24 }
 0x459   :  { %v848_v39 = vmul.f32 %v1295_v34, %v769_v36  ;;  %v867_v46 = vadd.f32 %v1675_v16, %v849_v38  ;;  %v958_v33 = vsub.s32 %v955_v26, %v1696_v27  ;;  %v1046_v22 = vadd.s32 4294967176, %v1693_v24 }
 0x45a   :  { %v1227_v40 = vpop.f32.mrf.mxu0 }
 0x45b   :  { %v866_v42 = vadd.f32 %v1675_v16, %v848_v39  ;;  %901 = vperm.xlu1 %1252, %v864_v37   ;;  %v851_v45 = vmul.f32 %v1301_v43, %v1227_v40  ;;  %v965_v39 = vsub.s32 %v962_v18, %v1696_v27  ;;  %v976_v40 = vadd.s32 4294967256, %v1693_v24 }
 0x45c   :  { %v779_v44 = vpop.f32.mrf.mxu0 }
 0x45d   :  { %v850_v47 = vmul.f32 %v1299_v41, %v779_v44  ;;  %907 = vperm.xlu0 %1251, %v866_v42   ;;  %v869_v53 = vadd.f32 %v1675_v16, %v851_v45  ;;  %v972_v41 = vsub.s32 %v969_v35, %v1696_v27  ;;  %v983_v45 = vadd.s32 4294967248, %v1693_v24 }
 0x45e   :  { %v1230_v48 = vpop.f32.mrf.mxu0  ;;  %v1311_v5 = vpop.eup %1310 }
 0x45f   :  { %v868_v50 = vadd.f32 %v1675_v16, %v850_v47  ;;  %910 = vperm.xlu1 %1252, %v867_v46   ;;  %v853_v54 = vmul.f32 %v1305_v51, %v1230_v48  ;;  %v1313_v7 = vpop.eup %1312  ;;  %v979_v48 = vsub.s32 %v976_v40, %v1696_v27  ;;  %v990_v51 = vadd.s32 4294967240, %v1693_v24 }
 0x460   :  { %v789_v52 = vpop.f32.mrf.mxu0 }
 0x461   :  { %v852_v55 = vmul.f32 %v1303_v49, %v789_v52  ;;  %913 = vperm.xlu0 %1251, %v868_v50   ;;  %v871_v63 = vadd.f32 %v1675_v16, %v853_v54  ;;  %v986_v52 = vsub.s32 %v983_v45, %v1696_v27 }
 0x462   :  { %v1233_v56 = vpop.f32.mrf.mxu0  ;;  %v1315_v11 = vpop.eup %1314 }
 0x463   :  { %v870_v58 = vadd.f32 %v1675_v16, %v852_v55  ;;  %916 = vperm.xlu1 %1252, %v869_v53   ;;  %v855_v1 = vmul.f32 %v1309_v60, %v1233_v56  ;;  %v1317_v15 = vpop.eup %1316 }
 0x464   :  { %v799_v61 = vpop.f32.mrf.mxu0 }
 0x465   :  { %v854_v31 = vmul.f32 %v1307_v57, %v799_v61  ;;  %919 = vperm.xlu0 %1251, %v870_v58   ;;  %v873_v29 = vadd.f32 %v1675_v16, %v855_v1  ;;  %v997_v57 = vadd.s32 4294967232, %v1693_v24  ;;  %v993_v58 = vsub.s32 %v990_v51, %v1696_v27 }
 0x467   :  { %v872_v3 = vadd.f32 %v1675_v16, %v854_v31  ;;  %922 = vperm.xlu1 %1252, %v871_v63   ;;  %v1004_v63 = vadd.s32 4294967224, %v1693_v24  ;;  %v1000_v1 = vsub.s32 %v997_v57, %v1696_v27 }
 0x469   :  { %925 = vperm.xlu0 %1251, %v872_v3   ;;  %v1007_v0 = vsub.s32 %v1004_v63, %v1696_v27 }
 0x46b   :  { %928 = vperm.xlu1 %1252, %v873_v29  }
 0x484   :  { %v1236_v2 = vpop.f32.mrf.mxu0 }
 0x485   :  { %v857_v6 = vmul.f32 %v1311_v5, %v1236_v2  ;;  %v1018_v2 = vadd.s32 4294967208, %v1693_v24 }
 0x486   :  { %v809_v8 = vpop.f32.mrf.mxu0 }
 0x487   :  { %v875_v9 = vadd.f32 %v1675_v16, %v857_v6  ;;  %v856_v10 = vmul.f32 %v1313_v7, %v809_v8  ;;  %v1014_v6 = vsub.s32 %v1011_v62, %v1696_v27 }
 0x489   :  { %v874_v12 = vadd.f32 %v1675_v16, %v856_v10  ;;  %v1239_v13 = vpop.f32.mrf.mxu0  ;;  %934 = vperm.xlu1 %1252, %v875_v9   ;;  %v1025_v9 = vadd.s32 4294967200, %v1693_v24 }
 0x48a   :  { %v859_v14 = vmul.f32 %v1315_v11, %v1239_v13 }
 0x48b   :  { %v819_v17 = vpop.f32.mrf.mxu0  ;;  %931 = vperm.xlu0 %1251, %v874_v12   ;;  %v1021_v12 = vsub.s32 %v1018_v2, %v1696_v27 }
 0x48c   :  { %v877_v19 = vadd.f32 %v1675_v16, %v859_v14  ;;  %v858_v20 = vmul.f32 %v1317_v15, %v819_v17  ;;  %v1032_v15 = vadd.s32 4294967192, %v1693_v24  ;;  %v1028_v17 = vsub.s32 %v1025_v9, %v1696_v27 }
 0x48e   :  { %v876_v21 = vadd.f32 %v1675_v16, %v858_v20  ;;  %940 = vperm.xlu1 %1252, %v877_v19   ;;  %v951_v16 = vsub.s32 %v948_v28, %v1696_v27  ;;  %v1039_v20 = vadd.s32 4294967184, %v1693_v24  ;;  %v1035_v26 = vsub.s32 %v1032_v15, %v1696_v27 }
 0x490   :  { %937 = vperm.xlu0 %1251, %v876_v21  }
 0x4ce   :  { %v899_v23 = vpop.permute.xlu1 %898 }
 0x4cf   :  { %v952_v38 = vrot.slane %v899_v23, %v951_v16 }
 0x4d0   :  { %v896_v32 = vpop.permute.xlu0 %895 }
 0x4d1   :  { %v947_v36 = vrot.slane %v896_v32, %v946_v30  ;;  %v1042_v30 = vsub.s32 %v1039_v20, %v1696_v27 }
 0x4d2   :  { %v905_v25 = vpop.permute.xlu1 %904 }
 0x4d3   :  { %v954_v42 = vsel %vm953_vm1, %v952_v38, %v947_v36  ;;  %v966_v47 = vrot.slane %v905_v25, %v965_v39 }
 0x4d6   :  { %v902_v34 = vpop.permute.xlu1 %901 }
 0x4d7   :  { %v959_v37 = vrot.slane %v902_v34, %v958_v33  ;;  %v1049_v33 = vsub.s32 %v1046_v22, %v1696_v27 }
 0x4d8   :  { %v908_v43 = vpop.permute.xlu0 %907 }
 0x4d9   :  { %v961_v44 = vsel %vm960_vm2, %v959_v37, %v954_v42  ;;  %v973_v49 = vrot.slane %v908_v43, %v972_v41 }
 0x4da   :  { %v911_v46 = vpop.permute.xlu1 %910  ;;  %v968_v50 = vsel %vm967_vm3, %v966_v47, %v961_v44 }
 0x4db   :  { %v980_v53 = vrot.slane %v911_v46, %v979_v48  ;;  %v975_v55 = vsel %vm974_vm4, %v973_v49, %v968_v50 }
 0x4dc   :  { %v914_v54 = vpop.permute.xlu0 %913 }
 0x4dd   :  { %v987_v60 = vrot.slane %v914_v54, %v986_v52  ;;  %v982_v61 = vsel %vm981_vm5, %v980_v53, %v975_v55 }
 0x4de   :  { %v917_v56 = vpop.permute.xlu1 %916 }
 0x4df   :  { %v994_v31 = vrot.slane %v917_v56, %v993_v58  ;;  %v989_v29 = vsel %vm988_vm6, %v987_v60, %v982_v61 }
 0x4e0   :  { %v920_v3 = vpop.permute.xlu0 %919 }
 0x4e1   :  { %v1001_v59 = vrot.slane %v920_v3, %v1000_v1  ;;  %v996_v5 = vsel %vm995_vm7, %v994_v31, %v989_v29 }
 0x4e2   :  { %v923_v4 = vpop.permute.xlu1 %922 }
 0x4e3   :  { %v1008_v7 = vrot.slane %v923_v4, %v1007_v0  ;;  %v1003_v10 = vsel %vm1002_vm8, %v1001_v59, %v996_v5 }
 0x4e4   :  { %v926_v8 = vpop.permute.xlu0 %925 }
 0x4e5   :  { %v1015_v13 = vrot.slane %v926_v8, %v1014_v6  ;;  %v1010_v14 = vsel %vm1009_vm9, %v1008_v7, %v1003_v10 }
 0x4e6   :  { %v929_v11 = vpop.permute.xlu1 %928 }
 0x4e7   :  { %v1022_v21 = vrot.slane %v929_v11, %v1021_v12  ;;  %v1017_v23 = vsel %vm1016_vm10, %v1015_v13, %v1010_v14 }
 0x4e9   :  { %v1024_v32 = vsel %vm1023_vm11, %v1022_v21, %v1017_v23 }
 0x504   :  { %v935_v19 = vpop.permute.xlu1 %934 }
 0x505   :  { %v1036_v34 = vrot.slane %v935_v19, %v1035_v26 }
 0x506   :  { %v932_v25 = vpop.permute.xlu0 %931 }
 0x507   :  { %v1029_v28 = vrot.slane %v932_v25, %v1028_v17 }
 0x509   :  { %v1031_v16 = vsel %vm1030_vm12, %v1029_v28, %v1024_v32  ;;  %v941_v18 = vpop.permute.xlu1 %940 }
 0x50a   :  { %v1050_v36 = vrot.slane %v941_v18, %v1049_v33  ;;  %v1038_v37 = vsel %vm1037_vm13, %v1036_v34, %v1031_v16 }
 0x50b   :  { %v938_v35 = vpop.permute.xlu0 %937 }
 0x50c   :  { %v1043_v24 = vrot.slane %v938_v35, %v1042_v30 }
 0x50e   :  { %v1045_v38 = vsel %vm1044_vm14, %v1043_v24, %v1038_v37 }
 0x50f   :  { %v1052_v39 = vsel %vm1051_vm15, %v1050_v36, %v1045_v38 }
 0x510   :  { %1054 = vst [vmem:[%s1738_s6] sm:$0x1] %v1052_v39 }

</bundles_post_ra>
